<compile_context>
chip_gen: v7x
topology: tpu7x:2x2x1
jax: 0.10.0
libtpu: 0.0.40
codegen_flags: <defaults>
</compile_context>

<pallas_src>
import functools
import math

import jax
import jax.numpy as jnp
from jax.experimental import pallas as pl
from jax.experimental.pallas import tpu as pltpu

_MIB = 1024 * 1024
_MIN_TILE_BYTES = 2 * _MIB     # never shrink a block below this to gain steps
_STEP_TARGET = 4               # aim for ~4 grid steps when there is enough work
_SINGLE_TC_TOKENS = ("v5e", "v5 lite", "v5lite", "v6e", "v6 lite", "v6lite")


# ----------------------------------------------------------------------------
# Hardware-aware sizing helpers
# ----------------------------------------------------------------------------
def _device_kind():
    try:
        return jax.devices()[0].device_kind.lower()
    except Exception:
        return ""


def _is_single_tc_chip():
    k = _device_kind()
    return any(t in k for t in _SINGLE_TC_TOKENS)


def _is_multi_tc_chip():
    # Unknown chips are treated as 2-TC (the conservative choice for VMEM).
    return not _is_single_tc_chip()


def _vmem_per_core_bytes():
    cap = 0
    try:
        info = pltpu.get_tpu_info()
        cap = int(getattr(info, "vmem_capacity_bytes", 0) or 0)
    except Exception:
        cap = 0
    if cap <= 0:
        cap = 128 * _MIB if _is_single_tc_chip() else 64 * _MIB
    if _is_multi_tc_chip():
        # v7x has 64 MiB per TensorCore; clamp in case the query reports the
        # per-chip figure (128 MiB) — otherwise vmem_limit would exceed physical.
        cap = min(cap, 64 * _MIB)
    return cap


def _block_byte_budget():
    """Target bytes for one x block (x and out are each double-buffered)."""
    cap = _vmem_per_core_bytes()
    return int(min(16 * _MIB, max(2 * _MIB, cap // 8)))


def _vmem_limit_bytes():
    cap = _vmem_per_core_bytes()
    return int(min(100 * _MIB, max(32 * _MIB, int(cap * 0.7))))


def _row_quantum(dtype):
    """Sublane quantum: 8 rows for 32-bit, 16 for bf16, 32 for int8."""
    return 8 * max(1, 4 // jnp.dtype(dtype).itemsize)


def _round_up(a, b):
    return ((a + b - 1) // b) * b


def _sized_tile(total, quantum, bytes_per_unit):
    """Pick a tile along a splittable axis for a cdiv(total, tile) grid.

    The tile is a multiple of `quantum` (or full extent), fits the per-block
    VMEM budget, and the grid gets ~_STEP_TARGET steps (even count on 2-TC
    chips) when there is enough data — without shrinking below ~2 MiB.  Tail
    blocks are handled by Pallas' masked partial stores.
    """
    total = int(total)
    bytes_per_unit = max(1, int(bytes_per_unit))
    if total <= quantum:
        return total                                   # full-extent block
    if total * bytes_per_unit <= _MIN_TILE_BYTES:
        return total                                   # tiny: single block, no tail

    budget_units = max(1, _block_byte_budget() // bytes_per_unit)
    budget_tile = max(quantum, (budget_units // quantum) * quantum)
    min_units = max(1, _MIN_TILE_BYTES // bytes_per_unit)
    min_tile = max(quantum, (min_units // quantum) * quantum)

    step_tile = max(min_tile, _round_up(-(-total // _STEP_TARGET), quantum))
    tile = min(budget_tile, step_tile)
    tile = min(tile, (total // quantum) * quantum)     # never larger than the axis
    tile = max(quantum, tile)

    if _is_multi_tc_chip():
        # Prefer an even number of grid steps so both TensorCores get equal work.
        steps = -(-total // tile)
        if steps > 2 and steps % 2 == 1:
            alt = max(quantum, _round_up(-(-total // (steps + 1)), quantum))
            if (-(-total // alt)) % 2 == 0:
                tile = alt
    return tile


def _compiler_params(semantics):
    return pltpu.CompilerParams(
        dimension_semantics=semantics,
        vmem_limit_bytes=_vmem_limit_bytes(),
    )


def _cost_estimate(n_elems, n_rows, itemsize):
    return pl.CostEstimate(
        flops=int(9 * n_elems),
        transcendentals=int(n_rows),
        bytes_accessed=int(2 * n_elems * itemsize),
    )


# ----------------------------------------------------------------------------
# Kernels
# ----------------------------------------------------------------------------
def _ln_lastdim_kernel(x_ref, w_ref, b_ref, o_ref, *, eps):
    """LayerNorm over the last dim; block = (tm, C), C on lanes. Two-pass stats."""
    x = x_ref[...].astype(jnp.float32)                       # (tm, C)
    mean = jnp.mean(x, axis=-1, keepdims=True)
    d = x - mean
    var = jnp.mean(d * d, axis=-1, keepdims=True)
    inv = jax.lax.rsqrt(var + eps)
    w = w_ref[...].astype(jnp.float32)                       # (1, C)
    b = b_ref[...].astype(jnp.float32)
    o_ref[...] = (d * (inv * w) + b).astype(o_ref.dtype)


def _ln_packed_kernel(x_ref, w_ref, b_ref, seg_ref, segt_ref, o_ref, *, eps, c):
    """Lane-packed LayerNorm for narrow C: each lane-row holds g logical rows of
    width c (block minor dim g*c is a multiple of 128).  Per-row reduction and
    broadcast use precomputed 0/1 segment matrices on the (otherwise idle) MXU,
    so the vector stores stay lane-dense.  Two-pass statistics."""
    x = x_ref[...].astype(jnp.float32)                       # (tb, g*c)
    seg = seg_ref[...]                                       # (g*c, g) 0/1 f32
    seg_t = segt_ref[...]                                    # (g, g*c)
    inv_c = 1.0 / c
    mean = jnp.dot(x, seg, preferred_element_type=jnp.float32) * inv_c       # (tb, g)
    mean_b = jnp.dot(mean, seg_t, preferred_element_type=jnp.float32)        # (tb, g*c)
    d = x - mean_b
    var = jnp.dot(d * d, seg, preferred_element_type=jnp.float32) * inv_c    # (tb, g)
    inv = jax.lax.rsqrt(var + eps)
    inv_b = jnp.dot(inv, seg_t, preferred_element_type=jnp.float32)          # (tb, g*c)
    w = w_ref[...].astype(jnp.float32)                       # (1, g*c), pre-tiled
    b = b_ref[...].astype(jnp.float32)
    o_ref[...] = (d * inv_b * w + b).astype(o_ref.dtype)


def _ln_cfirst_kernel(x_ref, w_ref, b_ref, o_ref, *, eps):
    """NCHW-native LayerNorm over C: block = (1, C, tl); C on sublanes, spatial
    on lanes -> no host-side transposes, lane-dense even for tiny C."""
    x = x_ref[...].astype(jnp.float32)                       # (1, C, tl)
    mean = jnp.mean(x, axis=1, keepdims=True)                # (1, 1, tl)
    d = x - mean
    var = jnp.mean(d * d, axis=1, keepdims=True)
    inv = jax.lax.rsqrt(var + eps)
    w = w_ref[...].astype(jnp.float32)                       # (1, C, 1)
    b = b_ref[...].astype(jnp.float32)
    o_ref[...] = (d * (inv * w) + b).astype(o_ref.dtype)


# ----------------------------------------------------------------------------
# Wrappers
# ----------------------------------------------------------------------------
def _ln_rows_wide(x2d, weight, bias, eps):
    """channels_last, C a multiple of 128 (or un-packable): block = (tm, C)."""
    R, C = x2d.shape
    itemsize = x2d.dtype.itemsize
    tm = _sized_tile(R, _row_quantum(x2d.dtype), C * itemsize)
    return pl.pallas_call(
        functools.partial(_ln_lastdim_kernel, eps=eps),
        out_shape=jax.ShapeDtypeStruct((R, C), x2d.dtype),
        grid_spec=pltpu.PrefetchScalarGridSpec(
            num_scalar_prefetch=0,
            grid=(pl.cdiv(R, tm),),                      # tail block masked, no pad/slice
            in_specs=[
                pl.BlockSpec((tm, C), lambda i: (i, 0)),
                pl.BlockSpec((1, C), lambda i: (0, 0)),
                pl.BlockSpec((1, C), lambda i: (0, 0)),
            ],
            out_specs=pl.BlockSpec((tm, C), lambda i: (i, 0)),
        ),
        compiler_params=_compiler_params(("parallel",)),
        cost_estimate=_cost_estimate(R * C, R, itemsize),
    )(x2d, weight.reshape(1, C), bias.reshape(1, C))


def _ln_rows_packed(x2d, weight, bias, eps, g):
    """channels_last, narrow C: pack g rows per lane-row (minor dim g*C % 128 == 0)."""
    R, C = x2d.shape
    gc = g * C
    itemsize = x2d.dtype.itemsize
    q = _row_quantum(x2d.dtype)

    # Pad only to a multiple of g (needed so the (R,C)->(R/g,g*C) reshape is a
    # free contiguous view); tile tails are handled by cdiv + masked stores.
    R_g = _round_up(R, g)
    xp = x2d if R_g == R else jnp.pad(x2d, ((0, R_g - R), (0, 0)))
    Rp = R_g // g
    x_packed = xp.reshape(Rp, gc)

    # Constant 0/1 group-membership matrices: computed once on the host and
    # fetched once by the kernel (constant index_map), reused every grid step.
    lane = jnp.arange(gc, dtype=jnp.int32)
    grp = jnp.arange(g, dtype=jnp.int32)
    seg = (lane[:, None] // C == grp[None, :]).astype(jnp.float32)   # (gc, g)
    seg_t = seg.T                                                    # (g, gc)
    w_packed = jnp.tile(weight.reshape(-1), g).reshape(1, gc)
    b_packed = jnp.tile(bias.reshape(-1), g).reshape(1, gc)

    tb = _sized_tile(Rp, q, gc * itemsize)
    out = pl.pallas_call(
        functools.partial(_ln_packed_kernel, eps=eps, c=C),
        out_shape=jax.ShapeDtypeStruct((Rp, gc), x2d.dtype),
        grid_spec=pltpu.PrefetchScalarGridSpec(
            num_scalar_prefetch=0,
            grid=(pl.cdiv(Rp, tb),),
            in_specs=[
                pl.BlockSpec((tb, gc), lambda i: (i, 0)),
                pl.BlockSpec((1, gc), lambda i: (0, 0)),
                pl.BlockSpec((1, gc), lambda i: (0, 0)),
                pl.BlockSpec((gc, g), lambda i: (0, 0)),
                pl.BlockSpec((g, gc), lambda i: (0, 0)),
            ],
            out_specs=pl.BlockSpec((tb, gc), lambda i: (i, 0)),
        ),
        compiler_params=_compiler_params(("parallel",)),
        cost_estimate=_cost_estimate(Rp * gc, R_g, itemsize),
    )(x_packed, w_packed, b_packed, seg, seg_t)
    out = out.reshape(R_g, C)
    return out if R_g == R else out[:R]


def _ln_channels_last(x2d, weight, bias, eps):
    _, C = x2d.shape
    if C % 128 != 0:
        gc = math.lcm(C, 128)
        if gc <= 2048:              # lane-dense stores: biggest lever on v5e
            return _ln_rows_packed(x2d, weight, bias, eps, gc // C)
    return _ln_rows_wide(x2d, weight, bias, eps)


def _ln_channels_first(x, weight, bias, eps):
    """NCHW-native path: view x as (N, C, H*W), reduce over C on sublanes."""
    N, C, H, W = x.shape
    HW = H * W
    itemsize = x.dtype.itemsize
    x3 = x.reshape(N, C, HW)                     # contiguous -> free reshape

    tl = _sized_tile(HW, 128, C * itemsize)
    out = pl.pallas_call(
        functools.partial(_ln_cfirst_kernel, eps=eps),
        out_shape=jax.ShapeDtypeStruct((N, C, HW), x.dtype),
        grid_spec=pltpu.PrefetchScalarGridSpec(
            num_scalar_prefetch=0,
            grid=(N, pl.cdiv(HW, tl)),           # tail block masked, no pad/slice
            in_specs=[
                pl.BlockSpec((1, C, tl), lambda n, j: (n, 0, j)),
                pl.BlockSpec((1, C, 1), lambda n, j: (0, 0, 0)),
                pl.BlockSpec((1, C, 1), lambda n, j: (0, 0, 0)),
            ],
            out_specs=pl.BlockSpec((1, C, tl), lambda n, j: (n, 0, j)),
        ),
        compiler_params=_compiler_params(("parallel", "parallel")),
        cost_estimate=_cost_estimate(N * C * HW, N * HW, itemsize),
    )(x3, weight.reshape(1, C, 1), bias.reshape(1, C, 1))
    return out.reshape(N, C, H, W)


# ----------------------------------------------------------------------------
# Module
# ----------------------------------------------------------------------------
class LayerNormPallas:
    """JAX/Pallas port of the ConvNeXt-style LayerNorm module."""

    def __init__(self, normalized_shape, eps=1e-6, data_format="channels_last"):
        if data_format not in ("channels_last", "channels_first"):
            raise NotImplementedError
        self.eps = eps
        self.data_format = data_format
        self.normalized_shape = (int(normalized_shape),)
        c = int(normalized_shape)
        # Matches nn.Parameter(torch.ones(c)) / nn.Parameter(torch.zeros(c)).
        self.weight = jnp.ones((c,), jnp.float32)
        self.bias = jnp.zeros((c,), jnp.float32)

    def __call__(self, x):
        C = self.normalized_shape[0]
        if self.data_format == "channels_last":
            assert x.shape[-1] == C
            lead = x.shape[:-1]
            y2d = _ln_channels_last(x.reshape(-1, C), self.weight, self.bias, self.eps)
            return y2d.reshape(*lead, C)
        # channels_first: NCHW-native kernel, no transposes.
        assert x.shape[1] == C
        return _ln_channels_first(x, self.weight, self.bias, self.eps)


# ----------------------------------------------------------------------------
# Reference + test
# ----------------------------------------------------------------------------
def _reference(x, weight, bias, eps, data_format):
    if data_format == "channels_last":
        mean = jnp.mean(x, axis=-1, keepdims=True)
        var = jnp.mean((x - mean) ** 2, axis=-1, keepdims=True)
        return (x - mean) / jnp.sqrt(var + eps) * weight + bias
    u = jnp.mean(x, axis=1, keepdims=True)
    s = jnp.mean((x - u) ** 2, axis=1, keepdims=True)
    xn = (x - u) / jnp.sqrt(s + eps)
    return weight[:, None, None] * xn + bias[:, None, None]


if __name__ == "__main__":
    key = jax.random.PRNGKey(0)
    k1, k2, k3, k4 = jax.random.split(key, 4)

    N, C, H, W = 2, 4, 16, 16
    # Non-trivial affine params (set explicitly; module default stays ones/zeros).
    w_test = 1.0 + 0.01 * jnp.arange(C, dtype=jnp.float32)
    b_test = 0.001 * jnp.arange(C, dtype=jnp.float32)

    # 1) channels_first, NCHW input -> NCHW-native kernel (no transposes).
    x_cf = jax.random.normal(k1, (N, C, H, W), dtype=jnp.float32)
    ln_cf = LayerNormPallas(C, eps=1e-6, data_format="channels_first")
    ln_cf.weight, ln_cf.bias = w_test, b_test
    y_cf = jax.block_until_ready(ln_cf(x_cf))
    ref_cf = _reference(x_cf, ln_cf.weight, ln_cf.bias, ln_cf.eps, "channels_first")

    # 2) channels_last with small C -> lane-packed kernel (no pad: R % g == 0).
    x_cl = jax.random.normal(k2, (N, H, W, C), dtype=jnp.float32)
    ln_cl = LayerNormPallas(C, eps=1e-6, data_format="channels_last")
    ln_cl.weight, ln_cl.bias = w_test, b_test
    y_cl = jax.block_until_ready(ln_cl(x_cl))
    ref_cl = _reference(x_cl, ln_cl.weight, ln_cl.bias, ln_cl.eps, "channels_last")

    # 3) channels_last with wide C (multiple of 128) -> plain lane-major kernel.
    Cw = 256
    x_w = jax.random.normal(k3, (2, 8, Cw), dtype=jnp.float32)
    ln_w = LayerNormPallas(Cw, eps=1e-6, data_format="channels_last")
    ln_w.weight = 1.0 + 0.01 * jnp.arange(Cw, dtype=jnp.float32)
    ln_w.bias = 0.001 * jnp.arange(Cw, dtype=jnp.float32)
    y_w = jax.block_until_ready(ln_w(x_w))
    ref_w = _reference(x_w, ln_w.weight, ln_w.bias, ln_w.eps, "channels_last")

    # 4) channels_last, small C, row count NOT a multiple of the pack factor
    #    -> exercises the pad-to-g path of the packed kernel.
    x_r = jax.random.normal(k4, (5, 3, C), dtype=jnp.float32)
    ln_r = LayerNormPallas(C, eps=1e-6, data_format="channels_last")
    ln_r.weight, ln_r.bias = w_test, b_test
    y_r = jax.block_until_ready(ln_r(x_r))
    ref_r = _reference(x_r, ln_r.weight, ln_r.bias, ln_r.eps, "channels_last")

    assert y_cf.shape == x_cf.shape and y_cl.shape == x_cl.shape
    assert y_w.shape == x_w.shape and y_r.shape == x_r.shape
    assert jnp.allclose(y_cf, ref_cf, atol=1e-5, rtol=1e-5)
    assert jnp.allclose(y_cl, ref_cl, atol=1e-5, rtol=1e-5)
    assert jnp.allclose(y_w, ref_w, atol=1e-5, rtol=1e-5)
    assert jnp.allclose(y_r, ref_r, atol=1e-5, rtol=1e-5)
    print("KERNEL_OK")
</pallas_src>

<mosaic_0001>
module attributes {stable_mosaic.version = 11 : i64} {
  func.func @_ln_cfirst_kernel(%arg0: i32, %arg1: i32, %arg2: memref<1x4x256xf32, #tpu.memory_space<vmem>>, %arg3: memref<1x4x1xf32, #tpu.memory_space<vmem>>, %arg4: memref<1x4x1xf32, #tpu.memory_space<vmem>>, %arg5: memref<1x4x256xf32, #tpu.memory_space<vmem>>) attributes {dimension_semantics = [#tpu.dimension_semantics<parallel>, #tpu.dimension_semantics<parallel>], iteration_bounds = array<i64: 2, 1>, scalar_prefetch = 0 : i64, scratch_operands = 0 : i64, tpu.core_type = #tpu.core_type<tc>, window_params = [{transform_indices = @transform_0, window_bounds = array<i64: 1, 4, 256>}, {pipeline_mode = #tpu.pipeline_mode<synchronous>, transform_indices = @transform_1, window_bounds = array<i64: 1, 4, 1>}, {pipeline_mode = #tpu.pipeline_mode<synchronous>, transform_indices = @transform_2, window_bounds = array<i64: 1, 4, 1>}, {transform_indices = @transform_3, window_bounds = array<i64: 1, 4, 256>}]} {
    %c0 = arith.constant 0 : index
    %c0_0 = arith.constant 0 : index
    %c0_1 = arith.constant 0 : index
    %0 = vector.load %arg2[%c0, %c0_0, %c0_1] : memref<1x4x256xf32, #tpu.memory_space<vmem>>, vector<1x4x256xf32>
    %cst = arith.constant dense<0.000000e+00> : vector<1x256xf32>
    %1 = vector.multi_reduction <add>, %0, %cst [1] : vector<1x4x256xf32> to vector<1x256xf32>
    %2 = vector.shape_cast %1 : vector<1x256xf32> to vector<1x1x256xf32>
    %cst_2 = arith.constant 4.000000e+00 : f32
    %3 = vector.broadcast %cst_2 : f32 to vector<1x1x256xf32>
    %4 = arith.divf %2, %3 : vector<1x1x256xf32>
    %5 = vector.broadcast %4 : vector<1x1x256xf32> to vector<1x4x256xf32>
    %6 = arith.subf %0, %5 : vector<1x4x256xf32>
    %7 = arith.mulf %6, %6 : vector<1x4x256xf32>
    %cst_3 = arith.constant dense<0.000000e+00> : vector<1x256xf32>
    %8 = vector.multi_reduction <add>, %7, %cst_3 [1] : vector<1x4x256xf32> to vector<1x256xf32>
    %9 = vector.shape_cast %8 : vector<1x256xf32> to vector<1x1x256xf32>
    %cst_4 = arith.constant 4.000000e+00 : f32
    %10 = vector.broadcast %cst_4 : f32 to vector<1x1x256xf32>
    %11 = arith.divf %9, %10 : vector<1x1x256xf32>
    %cst_5 = arith.constant 9.99999997E-7 : f32
    %12 = vector.broadcast %cst_5 : f32 to vector<1x1x256xf32>
    %13 = arith.addf %11, %12 : vector<1x1x256xf32>
    %14 = math.rsqrt %13 : vector<1x1x256xf32>
    %c0_6 = arith.constant 0 : index
    %c0_7 = arith.constant 0 : index
    %c0_8 = arith.constant 0 : index
    %15 = vector.load %arg3[%c0_6, %c0_7, %c0_8] : memref<1x4x1xf32, #tpu.memory_space<vmem>>, vector<1x4x1xf32>
    %c0_9 = arith.constant 0 : index
    %c0_10 = arith.constant 0 : index
    %c0_11 = arith.constant 0 : index
    %16 = vector.load %arg4[%c0_9, %c0_10, %c0_11] : memref<1x4x1xf32, #tpu.memory_space<vmem>>, vector<1x4x1xf32>
    %17 = vector.broadcast %14 : vector<1x1x256xf32> to vector<1x4x256xf32>
    %18 = vector.broadcast %15 : vector<1x4x1xf32> to vector<1x4x256xf32>
    %19 = arith.mulf %17, %18 : vector<1x4x256xf32>
    %20 = arith.mulf %6, %19 : vector<1x4x256xf32>
    %21 = vector.broadcast %16 : vector<1x4x1xf32> to vector<1x4x256xf32>
    %22 = arith.addf %20, %21 : vector<1x4x256xf32>
    %c0_12 = arith.constant 0 : index
    %c0_13 = arith.constant 0 : index
    %c0_14 = arith.constant 0 : index
    %23 = vector.load %arg5[%c0_12, %c0_13, %c0_14] : memref<1x4x256xf32, #tpu.memory_space<vmem>>, vector<1x4x256xf32>
    tpu.vector_store %arg5[%c0_12, %c0_13, %c0_14], %22 {strides = array<i32>} : memref<1x4x256xf32, #tpu.memory_space<vmem>>, vector<1x4x256xf32>,
    return
  }
  func.func @transform_0(%arg0: i32, %arg1: i32) -> (i32, i32, i32) {
    %c0_i32 = arith.constant 0 : i32
    %c0_i32_0 = arith.constant 0 : i32
    return %arg0, %c0_i32, %arg1 : i32, i32, i32
  }
  func.func @transform_1(%arg0: i32, %arg1: i32) -> (i32, i32, i32) {
    %c0_i32 = arith.constant 0 : i32
    %c0_i32_0 = arith.constant 0 : i32
    %c0_i32_1 = arith.constant 0 : i32
    %c0_i32_2 = arith.constant 0 : i32
    return %c0_i32, %c0_i32_0, %c0_i32_1 : i32, i32, i32
  }
  func.func @transform_2(%arg0: i32, %arg1: i32) -> (i32, i32, i32) {
    %c0_i32 = arith.constant 0 : i32
    %c0_i32_0 = arith.constant 0 : i32
    %c0_i32_1 = arith.constant 0 : i32
    %c0_i32_2 = arith.constant 0 : i32
    return %c0_i32, %c0_i32_0, %c0_i32_1 : i32, i32, i32
  }
  func.func @transform_3(%arg0: i32, %arg1: i32) -> (i32, i32, i32) {
    %c0_i32 = arith.constant 0 : i32
    %c0_i32_0 = arith.constant 0 : i32
    return %arg0, %c0_i32, %arg1 : i32, i32, i32
  }
}

</mosaic_0001>

<bundles_post_ra>
// kernel: tpu_custom_call.1
= control target key start
LH: loop header
LB: loop body
LE: loop exit
PB: predicated region body
PF: predicated region fallthrough
CT: control target
= control target key end

     0   :  { %8 = vsyncpa [#allocation3], 0  ;;  %s798_s0 = inlined_call_operand.hbm [shape: f32[2,4,256], index: 0, kind: input, shape index: {}]   ;;  %s799_s1 = inlined_call_operand.vmem [shape: f32[1,4,1], index: 1, kind: input, shape index: {}]   ;;  %s800_s2 = inlined_call_operand.vmem [shape: f32[1,4,1], index: 2, kind: input, shape index: {}]   ;;  %s801_s3 = inlined_call_operand.hbm [shape: f32[2,4,256], index: 3, kind: output, shape index: {}]  }
   0x1   :  { %10 = vsyncpa [#allocation3 + $0x1], 0 }
   0x2   :  { %11 = vsyncpa [#allocation4], 0 }
   0x3   :  { %13 = vsyncpa [#allocation4 + $0x1], 0  ;;  %s612_s12 = smov 0   ;;  %s614_s13 = smov 0  }
   0x4   :  { %s616_s14 = smov 0   ;;  %s618_s15 = smov 0  }
   0x5   :  { %s620_s16 = smov 0   ;;  %s622_s17 = smov 0  }
   0x6 LB: > { %s387_s18 = sadd.s32 4294967295, %s586_s17   ;;  %s388_s19 = sadd.s32 4294967294, %s586_s17   ;;  %s586_s17 = sphi %s622_s17, %s19_s17   ;;  %s582_s16 = sphi %s620_s16, %s817_s16   ;;  %s578_s15 = sphi %s618_s15, %s816_s15   ;;  %s574_s14 = sphi %s616_s14, %s815_s14   ;;  %s570_s13 = sphi %s614_s13, %s814_s13   ;;  %s566_s12 = sphi %s612_s12, %s813_s12  }
   0x7   : > { %s31_s20 = sadd.s32 1, %s582_s16  ;;  %s40_s21 = sadd.s32 1, %s574_s14 }
   0x8   : > { %p33_p0 = scmp.ge.s32.totalorder %s31_s20, 2  ;;  %p47_p1 = scmp.ne.s32.totalorder %s574_s14, %s570_s13 }
   0x9   : > { %p48_p2 = scmp.eq.s32.totalorder %s586_s17, 0  ;;  %p53_p3 = scmp.ne.s32.totalorder %s570_s13, %s566_s12 }
   0xa   : > { %s819_s20 = smov (%p33_p0, %s31_s20), 0  ;;  %p54_p5 = scmp.eq.s32.totalorder %s387_s18, 0 }
   0xb   : > { %p653_p4 = por %p48_p2, %p47_p1  ;;  %s35_s23 = ssub.s32 %s582_s16, %s819_s20 }
   0xc   : > { %p121_p6 = scmp.eq.s32.totalorder %s387_s18, 1  ;;  %p38_p7 = scmp.eq.s32.totalorder %s35_s23, 0 }
   0xd   : > { %p659_p8 = por %p54_p5, %p53_p3  ;;  %p127_p10 = scmp.eq.s32.totalorder %s388_s19, 1 }
   0xe   : > { %p663_p9 = por %p121_p6, %p47_p1  ;;  %p416_p13 = scmp.lt.s32.totalorder %s586_s17, 2 }
   0xf   : > { %s668_s26 = scalar_select %p38_p7, %s574_s14, %s40_s21  }
  0x10   : > { %s805_s25 = scalar_select %p663_p9, 1, 0 }
  0x11   : > { %p670_p11 = por %p127_p10, %p53_p3  ;;  %s153_s28 = sand.u32 1, %s574_s14  }
  0x12   : > { %s391_s29 = sshll.u32 %s153_s28, 3  ;;  %s402_s30 = sshll.u32 %s582_s16, 7 }
  0x13   : > { %s806_s27 = scalar_select %p670_p11, 1, 0 }
  0x14   : > { %s681_s6 = scalar_lea.hbm %s798_s0, %s402_s30  ;;  %s157_s7 = scalar_lea.vmem [#allocation2], %s391_s29 }
  0x15   : > { %s167_s8 = sshll.u32 %s157_s7, 4  ;;  %p687_p0 = pnand %p416_p13, %p653_p4  ;;  %s683_s8 = int_to_ptr.vmem [resolvable:$true] %s167_s8 }
  0x16   : > { %s154_s10 = scalar_lea.sflag [#allocation3], %s153_s28  ;;  %s474_s11 = scalar_lea.hbm %s681_s6, 128 }
  0x17   : > { %p475_p3 = scmp.ne.s32.totalorder %s681_s6, %s474_s11  ;;  %p476_p5 = pneg %p687_p0 }
  0x18   : > { %s479_s21 = scalar_lea.hbm %s798_s0, 256  ;;  %p480_p4 = scmp.lt.u32.totalorder %s681_s6, %s798_s0 }
  0x19   : > { %p477_p6 = pnand %p476_p5, %p475_p3  ;;  %p481_p10 = scmp.lt.u32.totalorder %s479_s21, %s474_s11 }
  0x1a   : > { %p483_p12 = scmp.lt.u32.totalorder %s474_s11, %s681_s6 }
  0x1b   : > { %p478_p7 = pneg %p477_p6  ;;  %p482_p13 = por %p481_p10, %p480_p4 }
  0x1d   : > { %p484_p1 = por %p483_p12, %p482_p13 }
  0x1f   : > { %p485_p2 = pnand %p484_p1, %p478_p7 }
  0x21   : > { %488 = shalt.err (!%p485_p2)
}
  0x22   : > { %s489_s28 = scalar_lea.vmem %s683_s8, 128  ;;  %s588_s29 = smov [#allocation2]  }
  0x23   : > { %p490_p3 = scmp.ne.s32.totalorder %s683_s8, %s489_s28  ;;  %s494_s30 = sshll.u32 %s588_s29, 4  ;;  %s495_s30 = int_to_ptr.vmem [resolvable:$false] %s494_s30 }
  0x24   : > { %s496_s4 = scalar_lea.vmem %s495_s30, 256  ;;  %p497_p9 = scmp.lt.s32.totalorder %s683_s8, %s495_s30 }
  0x25   : > { %p492_p6 = pnand %p490_p3, %p476_p5  ;;  %p498_p4 = scmp.lt.s32.totalorder %s496_s4, %s489_s28 }
  0x27   : > { %p493_p11 = pneg %p492_p6  ;;  %p499_p10 = por %p498_p4, %p497_p9 }
  0x29   : > { %p500_p12 = pnand %p499_p10, %p493_p11 }
  0x2b   : > { %503 = shalt.err (!%p500_p12)
}
  0x2c   : > { %411 = dma.hbm_to_vmem [thread:$0]  (!%p687_p0), %s681_s6, 128, %s683_s8, %s154_s10  }
  0x2d   : > { %p808_p1 = scmp.lt.s32.totalorder %s586_s17, 3  ;;  %p809_p2 = scmp.ge.s32.totalorder %s586_s17, 1 }
  0x2f   : > { %p173_p5 = pnand %p809_p2, %p808_p1 }
  0x30   : > { %s723_s5 = sand.u32 (!%p173_p5), 1, %s570_s13  }
  0x31   : > { %176 = sbr.rel (%p173_p5) target bundleno = 209 (0xd1), region = 32  ;;  %s395_s7 = sshll.u32 (!%p173_p5), %s723_s5, 3 }
  0x32   : > { %s179_s11 = scalar_lea.sflag (!%p173_p5), [#allocation3], %s723_s5  ;;  %s182_s9 = scalar_lea.vmem (!%p173_p5), [#allocation2], %s395_s7 }
  0x38   : > { %557 = dma.done.wait (%p659_p8), %s179_s11, 128  }
  0x39   : > { %559 = vsyncadd (%p659_p8), %s179_s11, 4294967168  ;;  %v589_v0 = vmov 0   ;;  %v258_v1 = vld [vmem:[%s799_s1] sm:$0xf]  ;;  %vm211_vm0 = vcmask 1043456   ;;  %v279_v45 = vlaneseq  ;;  %s403_s24 = sshll.u32 %s578_s15, 7 }
  0x3a   : > { %468 = vset.pattern.permute.xlu0 %v589_v0  ;;  %v259_v2 = vld [vmem:[%s800_s2] sm:$0xf]  ;;  %v590_v43 = vmov 839922192   ;;  %s204_s19 = scalar_lea.vmem [#allocation5], %s395_s7  ;;  %s749_s28 = scalar_lea.hbm %s801_s3, %s403_s24 }
  0x3b   : > { %262 = vperm.xlu0 %468, %v258_v1   ;;  %v207_v3 = vld [vmem:[%s182_s9] sm:$0xff]  ;;  %v277_v44 = vunpack.c.l.s4 %v590_v43  ;;  %v280_v48 = vshrl.u32 %v279_v45, 7  ;;  %s303_s21 = sshll.u32 %s204_s19, 4  ;;  %s287_s29 = scalar_lea.sflag [#allocation4], %s723_s5  ;;  %s751_s21 = int_to_ptr.vmem [resolvable:$true] %s303_s21 }
  0x3c   : > { %v209_v4 = vcombine.high %v207_v3, %v207_v3  ;;  %v212_v5 = vsel %vm211_vm0, %v207_v3, 0.0  ;;  %s504_s30 = scalar_lea.vmem %s751_s21, 128  ;;  %p810_p9 = scmp.ne.s32.totalorder %s805_s25, 0 }
  0x3d   : > { %v213_v7 = vrot.slane %v212_v5, 4  ;;  %v278_v47 = vunpack.c.0.s8 %v277_v44  ;;  %p505_p8 = scmp.ne.s32.totalorder %s751_s21, %s504_s30  ;;  %s591_s15 = smov [#allocation5]  }
  0x3e   : > { %v219_v6 = vsel %vm211_vm0, %v209_v4, 0.0  ;;  %s508_s4 = sshll.u32 %s591_s15, 4  ;;  %s509_s4 = int_to_ptr.vmem [resolvable:$false] %s508_s4 }
  0x3f   : > { %274 = vperm.xlu0 %468, %v259_v2   ;;  %v220_v8 = vrot.slane %v219_v6, 4  ;;  %v214_v9 = vadd.f32 %v213_v7, %v212_v5  ;;  %v281_v53 = vsub.s32 %v278_v47, %v280_v48  ;;  %p506_p11 = pnand %p505_p8, %p810_p9  ;;  %s510_s7 = scalar_lea.vmem %s509_s4, 256 }
  0x40   : > { %p511_p7 = scmp.lt.s32.totalorder %s751_s21, %s509_s4  ;;  %p512_p13 = scmp.lt.s32.totalorder %s510_s7, %s504_s30 }
  0x41   : > { %v221_v10 = vadd.f32 %v220_v8, %v219_v6  ;;  %v215_v11 = vrot.slane %v214_v9, 2  ;;  %p507_p0 = pneg %p506_p11 }
  0x42   : > { %p513_p3 = por %p512_p13, %p511_p7 }
  0x43   : > { %v222_v12 = vrot.slane %v221_v10, 2  ;;  %v216_v13 = vadd.f32 %v215_v11, %v214_v9 }
  0x44   : > { %p514_p6 = pnand %p513_p3, %p507_p0 }
  0x45   : > { %v223_v14 = vadd.f32 %v222_v12, %v221_v10  ;;  %v217_v15 = vrot.slane %v216_v13, 1 }
  0x47   : > { %v224_v16 = vrot.slane %v223_v14, 1  ;;  %v218_v17 = vadd.f32 %v217_v15, %v216_v13 }
  0x49   : > { %v225_v18 = vadd.f32 %v224_v16, %v223_v14  ;;  %v227_v19 = vmul.f32 0.25, %v218_v17 }
  0x4b   : > { %v228_v20 = vmul.f32 0.25, %v225_v18 }
  0x4d   : > { %v231_v21 = vcombine.low %v227_v19, %v228_v20 }
  0x4f   : > { %v233_v22 = vsub.f32 %v207_v3, %v231_v21 }
  0x51   : > { %v234_v23 = vmul.f32 %v233_v22, %v233_v22 }
  0x53   : > { %v236_v24 = vcombine.high %v234_v23, %v234_v23  ;;  %v238_v25 = vsel %vm211_vm0, %v234_v23, 0.0 }
  0x54   : > { %v239_v27 = vrot.slane %v238_v25, 4 }
  0x55   : > { %v245_v26 = vsel %vm211_vm0, %v236_v24, 0.0 }
  0x56   : > { %v246_v28 = vrot.slane %v245_v26, 4  ;;  %v240_v29 = vadd.f32 %v239_v27, %v238_v25 }
  0x58   : > { %v247_v30 = vadd.f32 %v246_v28, %v245_v26  ;;  %v241_v31 = vrot.slane %v240_v29, 2 }
  0x5a   : > { %v248_v32 = vrot.slane %v247_v30, 2  ;;  %v242_v33 = vadd.f32 %v241_v31, %v240_v29 }
  0x5c   : > { %v249_v34 = vadd.f32 %v248_v32, %v247_v30  ;;  %v243_v35 = vrot.slane %v242_v33, 1 }
  0x5e   : > { %v250_v36 = vrot.slane %v249_v34, 1  ;;  %v244_v37 = vadd.f32 %v243_v35, %v242_v33 }
  0x60   : > { %v251_v38 = vadd.f32 %v250_v36, %v249_v34  ;;  %v252_v39 = vmul.f32 0.25, %v244_v37 }
  0x62   : > { %v253_v40 = vmul.f32 0.25, %v251_v38  ;;  %v254_v41 = vadd.f32 1e-06, %v252_v39 }
  0x64   : > { %v255_v42 = vadd.f32 1e-06, %v253_v40  ;;  %470 = vrsqrt.f32 %v254_v41 }
  0x66   : > { %472 = vrsqrt.f32 %v255_v42 }
  0x6e   : > { %v471_v46 = vpop.eup %470 }
  0x70   : > { %v473_v49 = vpop.eup %472 }
  0xba   : > { %v263_v50 = vpop.permute.xlu0 %262 }
  0xbb   : > { %v265_v51 = vmul.f32 %v471_v46, %v263_v50  ;;  %v266_v52 = vmul.f32 %v473_v49, %v263_v50 }
  0xbd   : > { %v269_v54 = vcombine.low %v265_v51, %v266_v52 }
  0xbe   : > { %v275_v55 = vpop.permute.xlu0 %274 }
  0xbf   : > { %v271_v56 = vmul.f32 %v269_v54, %v233_v22  ;;  %v282_v57 = vrot.slane %v275_v55, %v281_v53 }
  0xc1   : > { %v284_v58 = vadd.f32 %v282_v57, %v271_v56 }
  0xc3   : > { %285 = vst [vmem:[%s204_s19] sm:$0xff] %v284_v58 }
  0xc4   : > { %517 = shalt.err (!%p514_p6)
}
  0xc5   : > { %s518_s5 = scalar_lea.hbm %s749_s28, 128  ;;  %s522_s6 = scalar_lea.hbm %s801_s3, 256 }
  0xc6   : > { %p519_p4 = scmp.ne.s32.totalorder %s749_s28, %s518_s5  ;;  %p523_p1 = scmp.lt.u32.totalorder %s749_s28, %s801_s3 }
  0xc7   : > { %p524_p2 = scmp.lt.u32.totalorder %s522_s6, %s518_s5  ;;  %p526_p8 = scmp.lt.u32.totalorder %s518_s5, %s749_s28 }
  0xc8   : > { %p520_p10 = pnand %p519_p4, %p810_p9 }
  0xc9   : > { %p525_p5 = por %p524_p2, %p523_p1 }
  0xca   : > { %p521_p12 = pneg %p520_p10 }
  0xcb   : > { %p527_p11 = por %p526_p8, %p525_p5 }
  0xcd   : > { %p528_p0 = pnand %p527_p11, %p521_p12 }
  0xcf   : > { %531 = shalt.err (!%p528_p0)
}
  0xd0   : > { %406 = dma.vmem_to_hbm [thread:$0]  (%p810_p9), %s751_s21, 128, %s749_s28, %s287_s29  }
  0xd1 PF: > { %s315_s18 = sand.u32 1, %s566_s12   ;;  %p811_p7 = scmp.ne.s32.totalorder %s806_s27, 0 }
  0xd2   : > { %p812_p13 = scmp.ge.s32.totalorder %s586_s17, 2  ;;  %s316_s24 = scalar_lea.sflag [#allocation4], %s315_s18 }
  0xd4   : > { %p413_p3 = pnand %p812_p13, %p811_p7 }
  0xd6   : > { %561 = dma.done.wait (!%p413_p3), %s316_s24, 128  }
  0xd7   : > { %563 = vsyncadd (!%p413_p3), %s316_s24, 4294967168  ;;  %s19_s17 = sadd.s32 1, %s586_s17   ;;  %s813_s12 = smov %s570_s13 }
  0xd8   : > { %p16_p6 = scmp.ge.s32.totalorder %s19_s17, 4   ;;  %s814_s13 = smov %s574_s14 }
  0xd9   : > { %s815_s14 = smov %s668_s26  ;;  %s816_s15 = smov %s582_s16 }
  0xda   : > { %s817_s16 = smov %s819_s20  ;;  %18 = sbr.rel (!%p16_p6) target bundleno = 6 (0x6), region = 77 }
  0xe1   :  { %321 = vsyncpa [#allocation3], 1 }
  0xe2   :  { %323 = vsyncpa [#allocation3 + $0x1], 1 }
  0xe3   :  { %324 = vsyncpa [#allocation4], 1 }
  0xe4   :  { %326 = vsyncpa [#allocation4 + $0x1], 1 }

</bundles_post_ra>
